<compile_context>
chip_gen: v7x
topology: tpu7x:2x2x1
jax: 0.10.0
libtpu: 0.0.40
codegen_flags: <defaults>
</compile_context>

<pallas_src>
import jax
import jax.numpy as jnp
from jax.experimental import pallas as pl
from jax.experimental.pallas import tpu as pltpu


_NEG_INF = -1e10                          # Python float -> jaxpr literal (no captured const)
_VMEM_STREAM_BUDGET = 16 * 1024 * 1024    # double-buffered x+mask+out streams; safe on v7x
_VMEM_LIMIT_BYTES = 32 * 1024 * 1024      # raise scoped VMEM (v5e default is only 16 MiB)


def _mode_and_logprob(masked_t, out_ref):
    """masked_t: (A, TB) f32 logits with batch on the lane axis. Writes the (2, TB) slab."""
    a_dim = masked_t.shape[0]                                         # Python int (literal)
    m = jnp.max(masked_t, axis=0, keepdims=True)                      # (1, TB)
    ids = jax.lax.broadcasted_iota(jnp.int32, masked_t.shape, 0)      # (A, TB)
    cand = jnp.where(masked_t == m, ids, a_dim)                       # first-max index
    action = jnp.min(cand, axis=0, keepdims=True)                     # (1, TB)
    # logp(argmax) = masked[argmax] - logsumexp = m - (m + log(sum exp(masked - m)))
    logp = -jnp.log(jnp.sum(jnp.exp(masked_t - m), axis=0, keepdims=True))
    # Single full-block store (avoids two sublane-masked partial stores per tile).
    # Actions round-trip through f32: exact for action_dim < 2^24 (asserted in wrapper).
    out_ref[...] = jnp.concatenate([action.astype(jnp.float32), logp], axis=0)


def _logits_t(x_ref, w_ref, b_ref):
    # (A, TB) = W @ x^T : contraction over D on both operands; batch ends up on lanes.
    # x/w stay in their native dtype (bf16 goes straight to the MXU, f32 acc).
    logits = jax.lax.dot_general(w_ref[...], x_ref[...],
                                 (((1,), (1,)), ((), ())),
                                 preferred_element_type=jnp.float32)
    return logits + b_ref[...]                                        # (A, 1) bias broadcasts on lanes


def _act_kernel_masked(x_ref, w_ref, b_ref, avail_ref, out_ref):
    logits = _logits_t(x_ref, w_ref, b_ref)                           # (A, TB)
    # Mask arrives untransposed as (TB, A); relayout in-kernel (tiny, rides the XLU slot).
    avail_t = avail_ref[...].astype(jnp.float32).T                    # (A, TB)
    masked = jnp.where(avail_t != 0, logits, _NEG_INF)
    _mode_and_logprob(masked, out_ref)


def _act_kernel_nomask(x_ref, w_ref, b_ref, out_ref):
    _mode_and_logprob(_logits_t(x_ref, w_ref, b_ref), out_ref)


def _pick_batch_tile(B, D, A, x_itemsize, mask_itemsize, requested=None):
    """Batch-tile size: a multiple of 128 (or B itself when B <= 128)."""
    if B <= 128:
        return B  # single full-array block (block dims == array dims is always legal)

    def stream_bytes(t):
        # x tile + mask tile + out tile, each double-buffered by the pipeline.
        return 2 * t * (D * x_itemsize + A * mask_itemsize + 2 * 4)

    if requested is None:
        # Grow toward the VMEM budget: big tiles amortize the per-grid-step overhead
        # (this kernel is HBM / step-overhead bound, not compute bound).
        tb = 128
        while tb < 32768 and stream_bytes(tb * 2) <= _VMEM_STREAM_BUDGET:
            tb *= 2
    else:
        tb = max(128, (int(requested) // 128) * 128)   # keep the (8,128) layout rule
        while tb > 128 and stream_bytes(tb) > _VMEM_STREAM_BUDGET:
            tb //= 2

    # Megacore (v7x has 2 TensorCores): keep at least 2 parallel B-tiles when possible.
    while tb > 128 and pl.cdiv(B, tb) < 2:
        tb //= 2
    return tb


def act_layer_forward(x, weight, bias, available_actions=None, *, block_b=None):
    """ACTLayer.forward for a Discrete action space, deterministic=True.

    Args:
      x:      (B, D) features (f32 or bf16; bf16 is fed to the MXU directly).
      weight: (A, D) nn.Linear weight (native PyTorch layout).
      bias:   (A,)   bias.
      available_actions: optional (B, A) {0,1} mask (int8/bool/float accepted).
      block_b: optional batch-tile override (rounded down to a multiple of 128).

    Returns:
      actions:          (B, 1) int32   (torch would give int64)
      action_log_probs: (B, 1) float32
    """
    B, D = x.shape
    A, D2 = weight.shape
    assert D2 == D, "weight must be (action_dim, inputs_dim)"
    assert A < (1 << 24), "action ids round-trip through f32; need action_dim < 2^24"

    x_itemsize = jnp.dtype(x.dtype).itemsize

    if available_actions is not None and jnp.issubdtype(available_actions.dtype, jnp.floating):
        # Float masks would cost 4x the DMA bytes; shrink to int8 once in the wrapper.
        available_actions = (available_actions != 0).astype(jnp.int8)
    mask_itemsize = (jnp.dtype(available_actions.dtype).itemsize
                     if available_actions is not None else 0)

    tb = _pick_batch_tile(B, D, A, x_itemsize, mask_itemsize, block_b)
    num_tiles = pl.cdiv(B, tb)

    # MXU is natively bf16: keep the weight in x's dtype when x is low precision.
    w_dtype = jnp.float32 if x.dtype == jnp.float32 else x.dtype
    w_in = weight.astype(w_dtype)
    b2d = bias.reshape(A, 1).astype(jnp.float32)

    x_spec = pl.BlockSpec((tb, D), lambda i: (i, 0))
    w_spec = pl.BlockSpec((A, D), lambda i: (0, 0))       # VMEM-resident across all B-tiles
    b_spec = pl.BlockSpec((A, 1), lambda i: (0, 0))       # VMEM-resident across all B-tiles
    out_spec = pl.BlockSpec((2, tb), lambda i: (0, i))    # lane-dense output slab

    bytes_accessed = (B * D * x_itemsize + A * D * jnp.dtype(w_dtype).itemsize
                      + A * 4 + 2 * B * 4)

    if available_actions is None:
        kernel = _act_kernel_nomask
        operands = (x, w_in, b2d)
        in_specs = [x_spec, w_spec, b_spec]
    else:
        kernel = _act_kernel_masked
        operands = (x, w_in, b2d, available_actions)      # mask untransposed: (B, A)
        in_specs = [x_spec, w_spec, b_spec,
                    pl.BlockSpec((tb, A), lambda i: (i, 0))]
        bytes_accessed += B * A * mask_itemsize

    out = pl.pallas_call(
        kernel,
        out_shape=jax.ShapeDtypeStruct((2, B), jnp.float32),
        grid=(num_tiles,),
        in_specs=in_specs,
        out_specs=out_spec,
        compiler_params=pltpu.CompilerParams(
            dimension_semantics=("parallel",),            # megacore-shard B-tiles on v7x
            vmem_limit_bytes=_VMEM_LIMIT_BYTES,
        ),
        cost_estimate=pl.CostEstimate(
            flops=int(2 * B * D * A),
            transcendentals=int(B * A + B),
            bytes_accessed=int(bytes_accessed),
        ),
    )(*operands)

    actions = out[0, :].astype(jnp.int32).reshape(B, 1)
    logp = out[1, :].reshape(B, 1)
    return actions, logp


def _orthogonal_init(key, rows, cols, gain):
    # Deterministic orthogonal init (same idea as nn.init.orthogonal_).
    a = jax.random.normal(key, (max(rows, cols), min(rows, cols)), dtype=jnp.float32)
    q, _ = jnp.linalg.qr(a)
    q = q[:rows, :cols] if rows >= cols else q[:cols, :rows].T
    return gain * q


def _ref_forward(x, weight, bias, avail):
    """Pure-JAX reference of the deterministic Discrete forward path."""
    logits = x.astype(jnp.float32) @ weight.T.astype(jnp.float32) + bias
    if avail is not None:
        logits = jnp.where(avail != 0, logits, -1e10)
    act = jnp.argmax(logits, axis=-1, keepdims=True).astype(jnp.int32)
    logp = (jnp.take_along_axis(logits, act, axis=-1)
            - jax.nn.logsumexp(logits, axis=-1, keepdims=True))
    return act, logp


if __name__ == "__main__":
    key = jax.random.PRNGKey(0)
    kx, kw, km, kx2, km2 = jax.random.split(key, 5)

    D, A = 32, 8          # inputs_dim (hidden), action_space.n
    gain = 0.01
    # nn.Linear(D, A): weight (A, D) orthogonal*gain, bias zeros.
    weight = _orthogonal_init(kw, A, D, gain)             # (A, D)
    bias = jnp.zeros((A,), dtype=jnp.float32)

    # --- case 1: small batch, with available_actions mask (single full-array block) ---
    B1 = 6
    x1 = jax.random.normal(kx, (B1, D), dtype=jnp.float32)
    avail1 = (jax.random.uniform(km, (B1, A)) > 0.3).astype(jnp.int8)
    avail1 = avail1.at[:, 0].set(1)                       # at least one available action per row
    a1, lp1 = act_layer_forward(x1, weight, bias, avail1)
    a1, lp1 = jax.block_until_ready(a1), jax.block_until_ready(lp1)
    a1_ref, lp1_ref = _ref_forward(x1, weight, bias, avail1)
    assert a1.shape == (B1, 1) and lp1.shape == (B1, 1)
    assert bool(jnp.all(a1 == a1_ref))
    assert bool(jnp.allclose(lp1, lp1_ref, atol=1e-5, rtol=1e-5))

    # --- case 2: larger ragged batch -> multi-tile grid (auto tile), with mask ---
    B2 = 300
    x2 = jax.random.normal(kx2, (B2, D), dtype=jnp.float32)
    avail2 = (jax.random.uniform(km2, (B2, A)) > 0.3).astype(jnp.int8)
    avail2 = avail2.at[:, 0].set(1)
    a2, lp2 = act_layer_forward(x2, weight, bias, avail2)       # auto tile (>=2 parallel tiles)
    a2, lp2 = jax.block_until_ready(a2), jax.block_until_ready(lp2)
    a2_ref, lp2_ref = _ref_forward(x2, weight, bias, avail2)
    assert bool(jnp.all(a2 == a2_ref))
    assert bool(jnp.allclose(lp2, lp2_ref, atol=1e-5, rtol=1e-5))

    # --- case 3: explicit small tile override (exercises 3-tile grid + ragged tail) ---
    a2b, lp2b = act_layer_forward(x2, weight, bias, avail2, block_b=128)
    a2b, lp2b = jax.block_until_ready(a2b), jax.block_until_ready(lp2b)
    assert bool(jnp.all(a2b == a2_ref))
    assert bool(jnp.allclose(lp2b, lp2_ref, atol=1e-5, rtol=1e-5))

    # --- case 4: available_actions=None specialized kernel ---
    a3, lp3 = act_layer_forward(x2, weight, bias, None)
    a3, lp3 = jax.block_until_ready(a3), jax.block_until_ready(lp3)
    a3_ref, lp3_ref = _ref_forward(x2, weight, bias, None)
    assert bool(jnp.all(a3 == a3_ref))
    assert bool(jnp.allclose(lp3, lp3_ref, atol=1e-5, rtol=1e-5))

    print("KERNEL_OK")
</pallas_src>

<mosaic_0001>
module attributes {stable_mosaic.version = 11 : i64} {
  func.func @_act_kernel_masked(%arg0: i32, %arg1: memref<6x32xf32, #tpu.memory_space<vmem>>, %arg2: memref<8x32xf32, #tpu.memory_space<vmem>>, %arg3: memref<8x1xf32, #tpu.memory_space<vmem>>, %arg4: memref<6x8xi8, #tpu.memory_space<vmem>>, %arg5: memref<2x6xf32, #tpu.memory_space<vmem>>) attributes {dimension_semantics = [#tpu.dimension_semantics<parallel>], iteration_bounds = array<i64: 1>, scalar_prefetch = 0 : i64, scratch_operands = 0 : i64, tpu.core_type = #tpu.core_type<tc>, window_params = [{transform_indices = @transform_0, window_bounds = array<i64: 6, 32>}, {pipeline_mode = #tpu.pipeline_mode<synchronous>, transform_indices = @transform_1, window_bounds = array<i64: 8, 32>}, {pipeline_mode = #tpu.pipeline_mode<synchronous>, transform_indices = @transform_2, window_bounds = array<i64: 8, 1>}, {transform_indices = @transform_3, window_bounds = array<i64: 6, 8>}, {transform_indices = @transform_4, window_bounds = array<i64: 2, 6>}]} {
    %c0 = arith.constant 0 : index
    %c0_0 = arith.constant 0 : index
    %0 = vector.load %arg2[%c0, %c0_0] : memref<8x32xf32, #tpu.memory_space<vmem>>, vector<8x32xf32>
    %c0_1 = arith.constant 0 : index
    %c0_2 = arith.constant 0 : index
    %1 = vector.load %arg1[%c0_1, %c0_2] : memref<6x32xf32, #tpu.memory_space<vmem>>, vector<6x32xf32>
    %cst = arith.constant dense<0.000000e+00> : vector<8x6xf32>
    %2 = tpu.matmul %0, %1, %cst {dimension_numbers = #tpu.dot_dimension_numbers<[1], [1], [0], [0], [0, 0, 1, 0], [], []>} : vector<8x32xf32>, vector<6x32xf32>, vector<8x6xf32> -> vector<8x6xf32>
    %c0_3 = arith.constant 0 : index
    %c0_4 = arith.constant 0 : index
    %3 = vector.load %arg3[%c0_3, %c0_4] : memref<8x1xf32, #tpu.memory_space<vmem>>, vector<8x1xf32>
    %4 = vector.broadcast %3 : vector<8x1xf32> to vector<8x6xf32>
    %5 = arith.addf %2, %4 : vector<8x6xf32>
    %c0_5 = arith.constant 0 : index
    %c0_6 = arith.constant 0 : index
    %6 = vector.load %arg4[%c0_5, %c0_6] : memref<6x8xi8, #tpu.memory_space<vmem>>, vector<6x8xi8>
    %7 = arith.sitofp %6 : vector<6x8xi8> to vector<6x8xf32>
    %8 = tpu.transpose %7, [1, 0] : vector<6x8xf32> -> vector<8x6xf32>
    %cst_7 = arith.constant 0.000000e+00 : f32
    %9 = vector.broadcast %cst_7 : f32 to vector<8x6xf32>
    %10 = arith.cmpf one, %8, %9 : vector<8x6xf32>
    %cst_8 = arith.constant -1.000000e+10 : f32
    %11 = vector.broadcast %cst_8 : f32 to vector<8x6xf32>
    %12 = arith.select %10, %5, %11 : vector<8x6xi1>, vector<8x6xf32>
    %cst_9 = arith.constant dense<0xFF800000> : vector<6xf32>
    %13 = vector.multi_reduction <maximumf>, %12, %cst_9 [0] : vector<8x6xf32> to vector<6xf32>
    %14 = vector.shape_cast %13 : vector<6xf32> to vector<1x6xf32>
    %15 = tpu.iota {dimensions = array<i32: 0>} : vector<8x6xi32>
    %16 = vector.broadcast %14 : vector<1x6xf32> to vector<8x6xf32>
    %17 = arith.cmpf oeq, %12, %16 : vector<8x6xf32>
    %c8_i32 = arith.constant 8 : i32
    %18 = vector.broadcast %c8_i32 : i32 to vector<8x6xi32>
    %19 = arith.select %17, %15, %18 : vector<8x6xi1>, vector<8x6xi32>
    %cst_10 = arith.constant dense<2147483647> : vector<6xi32>
    %20 = vector.multi_reduction <minsi>, %19, %cst_10 [0] : vector<8x6xi32> to vector<6xi32>
    %21 = vector.shape_cast %20 : vector<6xi32> to vector<1x6xi32>
    %22 = vector.broadcast %14 : vector<1x6xf32> to vector<8x6xf32>
    %23 = arith.subf %12, %22 : vector<8x6xf32>
    %24 = math.exp %23 : vector<8x6xf32>
    %cst_11 = arith.constant dense<0.000000e+00> : vector<6xf32>
    %25 = vector.multi_reduction <add>, %24, %cst_11 [0] : vector<8x6xf32> to vector<6xf32>
    %26 = vector.shape_cast %25 : vector<6xf32> to vector<1x6xf32>
    %27 = math.log %26 : vector<1x6xf32>
    %cst_12 = arith.constant 0.000000e+00 : f32
    %28 = vector.broadcast %cst_12 : f32 to vector<1x6xf32>
    %29 = arith.subf %28, %27 : vector<1x6xf32>
    %30 = arith.sitofp %21 : vector<1x6xi32> to vector<1x6xf32>
    %31 = tpu.concatenate %30, %29 in 0 : vector<1x6xf32>, vector<1x6xf32> -> vector<2x6xf32>
    %c0_13 = arith.constant 0 : index
    %c0_14 = arith.constant 0 : index
    %32 = vector.load %arg5[%c0_13, %c0_14] : memref<2x6xf32, #tpu.memory_space<vmem>>, vector<2x6xf32>
    tpu.vector_store %arg5[%c0_13, %c0_14], %31 {strides = array<i32>} : memref<2x6xf32, #tpu.memory_space<vmem>>, vector<2x6xf32>,
    return
  }
  func.func @transform_0(%arg0: i32) -> (i32, i32) {
    %c0_i32 = arith.constant 0 : i32
    %c0_i32_0 = arith.constant 0 : i32
    return %arg0, %c0_i32 : i32, i32
  }
  func.func @transform_1(%arg0: i32) -> (i32, i32) {
    %c0_i32 = arith.constant 0 : i32
    %c0_i32_0 = arith.constant 0 : i32
    %c0_i32_1 = arith.constant 0 : i32
    return %c0_i32, %c0_i32_0 : i32, i32
  }
  func.func @transform_2(%arg0: i32) -> (i32, i32) {
    %c0_i32 = arith.constant 0 : i32
    %c0_i32_0 = arith.constant 0 : i32
    %c0_i32_1 = arith.constant 0 : i32
    return %c0_i32, %c0_i32_0 : i32, i32
  }
  func.func @transform_3(%arg0: i32) -> (i32, i32) {
    %c0_i32 = arith.constant 0 : i32
    %c0_i32_0 = arith.constant 0 : i32
    return %arg0, %c0_i32 : i32, i32
  }
  func.func @transform_4(%arg0: i32) -> (i32, i32) {
    %c0_i32 = arith.constant 0 : i32
    %c0_i32_0 = arith.constant 0 : i32
    return %c0_i32, %arg0 : i32, i32
  }
}

</mosaic_0001>

<bundles_post_ra>
// kernel: tpu_custom_call.1
= control target key start
LH: loop header
LB: loop body
LE: loop exit
PB: predicated region body
PF: predicated region fallthrough
CT: control target
= control target key end

     0   :  { %9 = vsyncpa [#allocation3], 0  ;;  %s340_s0 = inlined_call_operand.vmem [shape: f32[6,32], index: 0, kind: input, shape index: {}]   ;;  %s341_s1 = inlined_call_operand.hbm [shape: f32[8,32], index: 1, kind: input, shape index: {}]   ;;  %s342_s2 = inlined_call_operand.vmem [shape: f32[8,1], index: 2, kind: input, shape index: {}]   ;;  %s343_s3 = inlined_call_operand.vmem [shape: s8[6,8], index: 3, kind: input, shape index: {}]   ;;  %s344_s4 = inlined_call_operand.hbm [shape: f32[2,6], index: 4, kind: output, shape index: {}]  }
   0x1   :  { %10 = vsyncpa [#allocation4], 0  ;;  %s274_s15 = smov [#allocation2]   ;;  %s226_s19 = scalar_lea.hbm %s341_s1, 128 }
   0x2   :  { %s19_s16 = sshll.u32 %s274_s15, 4  ;;  %p227_p0 = scmp.ne.s32.totalorder %s341_s1, %s226_s19  ;;  %s20_s16 = int_to_ptr.vmem [resolvable:$true] %s19_s16 }
   0x3   :  { %p230_p1 = scmp.lt.u32.totalorder %s226_s19, %s341_s1 }
   0x5   :  { %p232_p2 = pnand %p230_p1, %p227_p0 }
   0x7   :  { %235 = shalt.err (!%p232_p2)
}
   0x8   :  { %s236_s24 = scalar_lea.vmem %s20_s16, 128  ;;  %p241_p4 = scmp.lt.s32.totalorder %s20_s16, %s20_s16 }
   0x9   :  { %p237_p3 = scmp.ne.s32.totalorder %s20_s16, %s236_s24  ;;  %p242_p5 = scmp.lt.s32.totalorder %s236_s24, %s236_s24 }
   0xb   :  { %p243_p6 = por %p242_p5, %p241_p4 }
   0xd   :  { %p244_p7 = pnand %p243_p6, %p237_p3 }
   0xf   :  { %247 = shalt.err (!%p244_p7)
}
  0x10   :  { %22 = dma.hbm_to_vmem [thread:$0]  %s341_s1, 128, %s20_s16, [#allocation3]  }
  0x11   :  { %270 = dma.done.wait [#allocation3], 128  }
  0x12   :  { %271 = vsyncadd [#allocation3], 4294967168  ;;  %v275_v0 = vmov 0.0   ;;  %vm276_vm0 = vmmov 0   ;;  %v277_v1 = vmov 0   ;;  %vm38_vm1 = vcmask 261120  }
  0x13   :  { %211 = vmatprep.subr.mxu0 %v275_v0  ;;  %213 = vmatprep.mubr.msk.f32.mxu0 %vm276_vm0, %v275_v0  ;;  %v31_v2 = vld [vmem:[%s340_s0] sm:$0x3f]  ;;  %vm152_vm3 = vcmask 48128   ;;  %v160_v20 = vlaneseq  ;;  %s278_s0 = smov [#allocation5]   ;;  %vm188_vm8 = vcmask 1040384   ;;  %vm190_vm9 = vcmask 41984  }
  0x14   :  { %221 = vset.pattern.permute.xlu0 %v277_v1  ;;  %v32_v3 = vld [vmem:[%s342_s2] sm:$0xff]  ;;  %212 = vmatpush3.xpose.msk.msra.mxu0 %vm38_vm1, %v31_v2  ;;  %s198_s2 = sshll.u32 %s278_s0, 4  ;;  %s199_s2 = int_to_ptr.vmem [resolvable:$true] %s198_s2 }
  0x15   :  { %v30_v4 = vld [vmem:[#allocation2] sm:$0xff]  ;;  %35 = vperm.xlu0 %221, %v32_v3   ;;  %v161_v23 = vshrl.u32 %v160_v20, 7  ;;  %p253_p9 = scmp.lt.s32.totalorder %s199_s2, %s199_s2 }
  0x16   :  { %v115_v5 = vld [vmem:[%s343_s3] sm:$0x3]  ;;  %s248_s3 = scalar_lea.vmem %s199_s2, 32 }
  0x17   :  { %214 = vmatmul.mubr.msk.f32.vlgmr.msra.gmra.mrb[0].mxu0 %vm38_vm1, %v30_v4  ;;  %v116_v6 = vunpack.c.0.s8 %v115_v5  ;;  %p249_p8 = scmp.ne.s32.totalorder %s199_s2, %s248_s3  ;;  %p254_p10 = scmp.lt.s32.totalorder %s248_s3, %s248_s3 }
  0x19   :  { %v117_v7 = vcvt.s32.f32 %v116_v6  ;;  %p255_p11 = por %p254_p10, %p253_p9 }
  0x1b   :  { %p256_p12 = pnand %p255_p11, %p249_p8 }
  0x33   :  { %118 = vxpose.xlu0.b32.start.end [1/1] (short) (narrow) %v117_v7, 8 }
  0x94   :  { %v36_v8 = vpop.permute.xlu0 %35 }
  0xb3   :  { %v134_v9 = vpop.trf.xlu0 }
  0xb4   :  { %vm150_vm2 = vcmp.ne.f32.partialorder %v134_v9, 0.0 }
  0xea   :  { %v111_v10 = vpop.f32.mrb[0].mxu0 }
  0xeb   :  { %v112_v11 = vadd.f32 %v111_v10, %v36_v8  ;;  %v215_v12 = vpop.f32.mrb[1].mxu0 }
  0xed   :  { %v151_v13 = vsel %vm150_vm2, %v112_v11, -1e+10 }
  0xee   :  { %v153_v14 = vsel %vm152_vm3, %v151_v13, -inf }
  0xef   :  { %v154_v15 = vrot.slane %v153_v14, 4 }
  0xf1   :  { %v155_v16 = vmax.f32 %v153_v14, %v154_v15 }
  0xf3   :  { %v156_v17 = vrot.slane %v155_v16, 2 }
  0xf5   :  { %v157_v18 = vmax.f32 %v155_v16, %v156_v17 }
  0xf7   :  { %v158_v19 = vrot.slane %v157_v18, 1 }
  0xf9   :  { %v159_v21 = vmax.f32 %v157_v18, %v158_v19 }
  0xfb   :  { %v174_v22 = vsub.f32 %v151_v13, %v159_v21  ;;  %vm162_vm4 = vcmp.eq.f32.partialorder %v151_v13, %v159_v21 }
  0xfc   :  { %v163_v25 = vsel %vm162_vm4, %v161_v23, 8 }
  0xfd   :  { %v175_v24 = vmul.f32 1.442695, %v174_v22  ;;  %v164_v26 = vsel %vm152_vm3, %v163_v25, 2147483647 }
  0xfe   :  { %v165_v27 = vrot.slane %v164_v26, 4 }
  0xff   :  { %222 = vpow2.f32 %v175_v24 }
 0x100   :  { %vm166_vm5 = vcmp.lt.s32.totalorder %v164_v26, %v165_v27 }
 0x101   :  { %v167_v31 = vsel %vm166_vm5, %v164_v26, %v165_v27 }
 0x102   :  { %v168_v34 = vrot.slane %v167_v31, 2 }
 0x104   :  { %vm169_vm6 = vcmp.lt.s32.totalorder %v167_v31, %v168_v34 }
 0x105   :  { %v170_v38 = vsel %vm169_vm6, %v167_v31, %v168_v34 }
 0x106   :  { %v171_v39 = vrot.slane %v170_v38, 1 }
 0x108   :  { %vm172_vm7 = vcmp.lt.s32.totalorder %v170_v38, %v171_v39 }
 0x109   :  { %v223_v28 = vpop.eup %222  ;;  %v173_v41 = vsel %vm172_vm7, %v170_v38, %v171_v39 }
 0x10a   :  { %v177_v29 = vsel %vm152_vm3, %v223_v28, 0.0  ;;  %v187_v44 = vcvt.s32.f32 %v173_v41 }
 0x10b   :  { %v178_v30 = vrot.slane %v177_v29, 4 }
 0x10d   :  { %v179_v32 = vadd.f32 %v178_v30, %v177_v29 }
 0x10f   :  { %v180_v33 = vrot.slane %v179_v32, 2 }
 0x111   :  { %v181_v35 = vadd.f32 %v180_v33, %v179_v32 }
 0x113   :  { %v182_v36 = vrot.slane %v181_v35, 1 }
 0x115   :  { %v183_v37 = vadd.f32 %v182_v36, %v181_v35 }
 0x117   :  { %224 = vlog2.f32 %v183_v37 }
 0x121   :  { %v225_v40 = vpop.eup %224 }
 0x122   :  { %v185_v42 = vmul.f32 0.6931472, %v225_v40 }
 0x124   :  { %v186_v43 = vsub.f32 0.0, %v185_v42 }
 0x126   :  { %v189_v45 = vsel %vm188_vm8, %v187_v44, %v186_v43 }
 0x127   :  { %191 = vst.msk [vmem:[#allocation5] sm:$0x3] %vm190_vm9, %v189_v45 }
 0x128   :  { %259 = shalt.err (!%p256_p12)
}
 0x129   :  { %s260_s8 = scalar_lea.hbm %s344_s4, 32 }
 0x12a   :  { %p261_p13 = scmp.ne.s32.totalorder %s344_s4, %s260_s8  ;;  %p264_p0 = scmp.lt.u32.totalorder %s260_s8, %s344_s4 }
 0x12c   :  { %p266_p1 = pnand %p264_p0, %p261_p13 }
 0x12e   :  { %269 = shalt.err (!%p266_p1)
}
 0x12f   :  { %201 = dma.vmem_to_hbm [thread:$0]  %s199_s2, 32, %s344_s4, [#allocation4]  }
 0x130   :  { %272 = dma.done.wait [#allocation4], 32  }
 0x131   :  { %273 = vsyncadd [#allocation4], 4294967264 }
 0x132   :  { %205 = vsyncpa [#allocation3], 1 }
 0x133   :  { %206 = vsyncpa [#allocation4], 1 }

</bundles_post_ra>
